<compile_context>
chip_gen: v7x
topology: tpu7x:2x2x1
jax: 0.10.0
libtpu: 0.0.40
codegen_flags: <defaults>
</compile_context>

<pallas_src>
import jax
import jax.numpy as jnp
from jax import lax
from jax.experimental import pallas as pl
from jax.experimental.pallas import tpu as pltpu


def _pick_tq(n):
    """Query-tile size: whole N for small inputs, 128-aligned tiles for large N."""
    if n <= 512 or n % 128 != 0:
        return n
    for tq in (512, 256, 128):
        if n % tq == 0:
            return tq
    return n


def _make_kernel(tq):
    def sa_layer_kernel(x_ref, wq_ref, wv_ref, bv_ref, wt_ref, shift_ref, out_ref,
                        xk_ref, xv_ref, num_ref, col_ref):
        q = pl.program_id(1)
        nq = pl.num_programs(1)

        # Per-batch init: shared q/k projection + v projection kept resident in bf16,
        # plus zeroed accumulators.
        @pl.when(q == 0)
        def _init():
            x = x_ref[...].astype(jnp.float32)                       # (C, N)
            xk = jnp.dot(wq_ref[...], x, preferred_element_type=jnp.float32)
            xk_ref[...] = xk.astype(xk_ref.dtype)                    # (C//4, N) bf16
            xv = jnp.dot(wv_ref[...], x,
                         preferred_element_type=jnp.float32) + bv_ref[...]
            xv_ref[...] = xv.astype(xv_ref.dtype)                    # (C, N) bf16
            num_ref[...] = jnp.zeros_like(num_ref)
            col_ref[...] = jnp.zeros_like(col_ref)

        qstart = q * tq
        if tq % 128 == 0:
            qstart = pl.multiple_of(qstart, 128)

        # Energy tile: (TQ, N) -- bf16 MXU inputs, f32 accumulation.
        xk = xk_ref[...]                                             # (C//4, N) bf16
        xq_t = xk_ref[:, pl.ds(qstart, tq)]                          # (C//4, TQ) bf16
        energy = jnp.einsum('cq,ck->qk', xq_t, xk,
                            preferred_element_type=jnp.float32)

        # Row softmax over keys; denominator via EUP approx reciprocal.
        m = jnp.max(energy, axis=-1, keepdims=True)
        e = jnp.exp(energy - m)
        attn = e * pl.reciprocal(jnp.sum(e, axis=-1, keepdims=True), approx=True)

        # Column-sum accumulator for the dim=1 normalization (applied at finalize).
        col_ref[...] += jnp.sum(attn, axis=0, keepdims=True)         # (1, N)

        # Accumulate x_r numerator: (C, TQ) @ (TQ, N), bf16 MXU inputs.
        xv_t = xv_ref[:, pl.ds(qstart, tq)]                          # (C, TQ) bf16
        num_ref[...] += jnp.dot(xv_t, attn.astype(jnp.bfloat16),
                                preferred_element_type=jnp.float32)  # (C, N)

        # Epilogue: normalize, trans_conv (BN + bias folded), ReLU, residual.
        @pl.when(q == nq - 1)
        def _finalize():
            x = x_ref[...].astype(jnp.float32)
            x_r = num_ref[...] * pl.reciprocal(1e-9 + col_ref[...], approx=True)
            d = x - x_r
            t = jnp.dot(wt_ref[...], d,
                        preferred_element_type=jnp.float32) + shift_ref[...]
            t = jnp.maximum(t, 0.0)
            out_ref[...] = (x + t).astype(out_ref.dtype)

    return sa_layer_kernel


def sa_layer(x, wq, wv, bv, wt, bt, gamma, beta, run_mean, run_var, eps=1e-5):
    B, C, N = x.shape
    c4 = wq.shape[0]

    # Fold eval-mode BatchNorm and trans_conv bias into the trans_conv weight.
    inv_std = 1.0 / jnp.sqrt(run_var + eps)
    scale = gamma * inv_std                                   # (C,)
    shift = beta - run_mean * scale                           # (C,)
    wt_fold = (scale[:, None] * wt).astype(jnp.float32)       # (C, C)
    shift_fold = (shift + scale * bt).reshape(C, 1).astype(jnp.float32)
    bv2 = bv.reshape(C, 1).astype(jnp.float32)

    tq = _pick_tq(N)
    nq = N // tq

    # Size the scoped VMEM limit to the actual working set (+ headroom), capped
    # for v7x's 64 MiB physical VMEM.
    f32, bf16 = 4, 2
    est = (
        2 * C * N * x.dtype.itemsize             # x block (double-buffered across b)
        + 2 * C * N * x.dtype.itemsize           # out block (double-buffered)
        + 2 * (c4 * C + 2 * C * C + 2 * C) * f32  # weights / biases
        + c4 * N * bf16                          # xk scratch (bf16)
        + C * N * bf16                           # xv scratch (bf16)
        + C * N * f32                            # x_r numerator scratch
        + 8 * N * f32                            # column-sum scratch (padded)
        + 6 * tq * N * f32                       # softmax-tile temporaries
    )
    vmem_limit = int(min(max(est + (8 << 20), 32 << 20), 64 << 20))

    flops = B * (2 * c4 * C * N        # q/k projection
                 + 2 * C * C * N       # v projection
                 + 2 * c4 * N * N      # energy
                 + 2 * C * N * N       # x_r numerator
                 + 2 * C * C * N)      # trans_conv
    cost = pl.CostEstimate(
        flops=int(flops),
        transcendentals=int(B * N * N),
        bytes_accessed=int(2 * B * C * N * x.dtype.itemsize
                           + (c4 * C + 2 * C * C + 2 * C) * f32),
    )

    return pl.pallas_call(
        _make_kernel(tq),
        out_shape=jax.ShapeDtypeStruct((B, C, N), x.dtype),
        grid_spec=pltpu.PrefetchScalarGridSpec(
            num_scalar_prefetch=0,
            grid=(B, nq),
            in_specs=[
                pl.BlockSpec((None, C, N), lambda b, q: (b, 0, 0)),   # x (full slab/batch)
                pl.BlockSpec((c4, C), lambda b, q: (0, 0)),           # shared q/k weight
                pl.BlockSpec((C, C), lambda b, q: (0, 0)),            # v weight
                pl.BlockSpec((C, 1), lambda b, q: (0, 0)),            # v bias
                pl.BlockSpec((C, C), lambda b, q: (0, 0)),            # trans weight (BN folded)
                pl.BlockSpec((C, 1), lambda b, q: (0, 0)),            # folded shift
            ],
            out_specs=pl.BlockSpec((None, C, N), lambda b, q: (b, 0, 0)),
            scratch_shapes=[
                pltpu.VMEM((c4, N), jnp.bfloat16),    # xk (shared q/k projection)
                pltpu.VMEM((C, N), jnp.bfloat16),     # xv (v projection + bias)
                pltpu.VMEM((C, N), jnp.float32),      # x_r numerator accumulator
                pltpu.VMEM((1, N), jnp.float32),      # attention column-sum accumulator
            ],
        ),
        compiler_params=pltpu.CompilerParams(
            dimension_semantics=("parallel", "arbitrary"),
            vmem_limit_bytes=vmem_limit,
        ),
        cost_estimate=cost,
    )(x, wq.astype(jnp.float32), wv.astype(jnp.float32), bv2,
      wt_fold, shift_fold)


def sa_layer_ref(x, wq, wv, bv, wt, bt, gamma, beta, run_mean, run_var, eps=1e-5):
    """Pure-JAX reference (eval-mode BatchNorm), f32."""
    xq = jnp.einsum('oc,bcn->bon', wq, x)                 # (B, C//4, N)
    energy = jnp.einsum('bcn,bcm->bnm', xq, xq)           # (B, N, N)
    attn = jax.nn.softmax(energy, axis=-1)
    attn = attn / (1e-9 + jnp.sum(attn, axis=1, keepdims=True))
    xv = jnp.einsum('oc,bcn->bon', wv, x) + bv[None, :, None]
    x_r = jnp.einsum('bcn,bnm->bcm', xv, attn)
    d = x - x_r
    t = jnp.einsum('oc,bcn->bon', wt, d) + bt[None, :, None]
    t = (t - run_mean[None, :, None]) / jnp.sqrt(run_var[None, :, None] + eps)
    t = t * gamma[None, :, None] + beta[None, :, None]
    t = jnp.maximum(t, 0.0)
    return x + t


def _make_params(key, C):
    kq, kv, kbv, kt, kbt, kg, kb = jax.random.split(key, 7)
    wq = 0.1 * jax.random.normal(kq, (C // 4, C), dtype=jnp.float32)   # shared q/k weight
    wv = 0.1 * jax.random.normal(kv, (C, C), dtype=jnp.float32)
    bv = 0.1 * jax.random.normal(kbv, (C,), dtype=jnp.float32)
    wt = 0.1 * jax.random.normal(kt, (C, C), dtype=jnp.float32)
    bt = 0.1 * jax.random.normal(kbt, (C,), dtype=jnp.float32)
    gamma = 1.0 + 0.05 * jax.random.normal(kg, (C,), dtype=jnp.float32)
    beta = 0.05 * jax.random.normal(kb, (C,), dtype=jnp.float32)
    run_mean = jnp.zeros((C,), dtype=jnp.float32)
    run_var = jnp.ones((C,), dtype=jnp.float32)
    return wq, wv, bv, wt, bt, gamma, beta, run_mean, run_var


def _check(B, C, N, key):
    kx, kp = jax.random.split(key)
    x = jax.random.normal(kx, (B, C, N), dtype=jnp.float32)
    params = _make_params(kp, C)

    out = sa_layer(x, *params)
    out = jax.block_until_ready(out)
    ref = sa_layer_ref(x, *params)

    assert out.shape == (B, C, N)
    err = float(jnp.max(jnp.abs(out - ref)))
    # bf16 MXU inputs + approx reciprocals -> loosened tolerance vs the f32 reference.
    assert jnp.allclose(out, ref, atol=3e-2, rtol=3e-2), f"max abs err = {err}"


if __name__ == "__main__":
    key = jax.random.PRNGKey(0)
    k0, k1 = jax.random.split(key)

    # Small shape (single query tile per batch).
    _check(B=2, C=32, N=128, key=k0)

    # Larger N exercises the flash-style query-tiled accumulation path (TQ=512, 2 tiles).
    _check(B=2, C=32, N=1024, key=k1)

    print("KERNEL_OK")
</pallas_src>

<mosaic_0001>
module attributes {stable_mosaic.version = 11 : i64} {
  func.func @sa_layer_kernel(%arg0: i32, %arg1: i32, %arg2: memref<1x32x128xf32, #tpu.memory_space<vmem>>, %arg3: memref<8x32xf32, #tpu.memory_space<vmem>>, %arg4: memref<32x32xf32, #tpu.memory_space<vmem>>, %arg5: memref<32x1xf32, #tpu.memory_space<vmem>>, %arg6: memref<32x32xf32, #tpu.memory_space<vmem>>, %arg7: memref<32x1xf32, #tpu.memory_space<vmem>>, %arg8: memref<1x32x128xf32, #tpu.memory_space<vmem>>, %arg9: memref<8x128xbf16, #tpu.memory_space<vmem>>, %arg10: memref<32x128xbf16, #tpu.memory_space<vmem>>, %arg11: memref<32x128xf32, #tpu.memory_space<vmem>>, %arg12: memref<1x128xf32, #tpu.memory_space<vmem>>) attributes {dimension_semantics = [#tpu.dimension_semantics<parallel>, #tpu.dimension_semantics<arbitrary>], iteration_bounds = array<i64: 2, 1>, scalar_prefetch = 0 : i64, scratch_operands = 4 : i64, tpu.core_type = #tpu.core_type<tc>, window_params = [{transform_indices = @transform_0, window_bounds = array<i64: 1, 32, 128>}, {pipeline_mode = #tpu.pipeline_mode<synchronous>, transform_indices = @transform_1, window_bounds = array<i64: 8, 32>}, {pipeline_mode = #tpu.pipeline_mode<synchronous>, transform_indices = @transform_2, window_bounds = array<i64: 32, 32>}, {pipeline_mode = #tpu.pipeline_mode<synchronous>, transform_indices = @transform_3, window_bounds = array<i64: 32, 1>}, {pipeline_mode = #tpu.pipeline_mode<synchronous>, transform_indices = @transform_4, window_bounds = array<i64: 32, 32>}, {pipeline_mode = #tpu.pipeline_mode<synchronous>, transform_indices = @transform_5, window_bounds = array<i64: 32, 1>}, {transform_indices = @transform_6, window_bounds = array<i64: 1, 32, 128>}]} {
    %c0_i32 = arith.constant 0 : i32
    %0 = arith.cmpi eq, %arg1, %c0_i32 : i32
    %1 = arith.extui %0 : i1 to i32
    %c0_i32_0 = arith.constant 0 : i32
    %2 = arith.cmpi ne, %1, %c0_i32_0 : i32
    scf.if %2 {
      %c0_18 = arith.constant 0 : index
      %c0_19 = arith.constant 0 : index
      %c0_20 = arith.constant 0 : index
      %34 = vector.load %arg2[%c0_18, %c0_19, %c0_20] : memref<1x32x128xf32, #tpu.memory_space<vmem>>, vector<1x32x128xf32>
      %35 = vector.shape_cast %34 : vector<1x32x128xf32> to vector<32x128xf32>
      %c0_21 = arith.constant 0 : index
      %c0_22 = arith.constant 0 : index
      %36 = vector.load %arg3[%c0_21, %c0_22] : memref<8x32xf32, #tpu.memory_space<vmem>>, vector<8x32xf32>
      %cst_23 = arith.constant dense<0.000000e+00> : vector<8x128xf32>
      %37 = tpu.matmul %36, %35, %cst_23 {dimension_numbers = #tpu.dot_dimension_numbers<[1], [0], [0], [1], [0, 0, 1, 1], [], []>} : vector<8x32xf32>, vector<32x128xf32>, vector<8x128xf32> -> vector<8x128xf32>
      %38 = arith.truncf %37 : vector<8x128xf32> to vector<8x128xbf16>
      %c0_24 = arith.constant 0 : index
      %c0_25 = arith.constant 0 : index
      %39 = vector.load %arg9[%c0_24, %c0_25] : memref<8x128xbf16, #tpu.memory_space<vmem>>, vector<8x128xbf16>
      tpu.vector_store %arg9[%c0_24, %c0_25], %38 {strides = array<i32>} : memref<8x128xbf16, #tpu.memory_space<vmem>>, vector<8x128xbf16>,
      %c0_26 = arith.constant 0 : index
      %c0_27 = arith.constant 0 : index
      %40 = vector.load %arg4[%c0_26, %c0_27] : memref<32x32xf32, #tpu.memory_space<vmem>>, vector<32x32xf32>
      %cst_28 = arith.constant dense<0.000000e+00> : vector<32x128xf32>
      %41 = tpu.matmul %40, %35, %cst_28 {dimension_numbers = #tpu.dot_dimension_numbers<[1], [0], [0], [1], [0, 0, 1, 1], [], []>} : vector<32x32xf32>, vector<32x128xf32>, vector<32x128xf32> -> vector<32x128xf32>
      %c0_29 = arith.constant 0 : index
      %c0_30 = arith.constant 0 : index
      %42 = vector.load %arg5[%c0_29, %c0_30] : memref<32x1xf32, #tpu.memory_space<vmem>>, vector<32x1xf32>
      %43 = vector.broadcast %42 : vector<32x1xf32> to vector<32x128xf32>
      %44 = arith.addf %41, %43 : vector<32x128xf32>
      %45 = arith.truncf %44 : vector<32x128xf32> to vector<32x128xbf16>
      %c0_31 = arith.constant 0 : index
      %c0_32 = arith.constant 0 : index
      %46 = vector.load %arg10[%c0_31, %c0_32] : memref<32x128xbf16, #tpu.memory_space<vmem>>, vector<32x128xbf16>
      tpu.vector_store %arg10[%c0_31, %c0_32], %45 {strides = array<i32>} : memref<32x128xbf16, #tpu.memory_space<vmem>>, vector<32x128xbf16>,
      %cst_33 = arith.constant 0.000000e+00 : f32
      %47 = vector.broadcast %cst_33 : f32 to vector<32x128xf32>
      %c0_34 = arith.constant 0 : index
      %c0_35 = arith.constant 0 : index
      %48 = vector.load %arg11[%c0_34, %c0_35] : memref<32x128xf32, #tpu.memory_space<vmem>>, vector<32x128xf32>
      tpu.vector_store %arg11[%c0_34, %c0_35], %47 {strides = array<i32>} : memref<32x128xf32, #tpu.memory_space<vmem>>, vector<32x128xf32>,
      %cst_36 = arith.constant 0.000000e+00 : f32
      %49 = vector.broadcast %cst_36 : f32 to vector<1x128xf32>
      %c0_37 = arith.constant 0 : index
      %c0_38 = arith.constant 0 : index
      %50 = vector.load %arg12[%c0_37, %c0_38] : memref<1x128xf32, #tpu.memory_space<vmem>>, vector<1x128xf32>
      tpu.vector_store %arg12[%c0_37, %c0_38], %49 {strides = array<i32>} : memref<1x128xf32, #tpu.memory_space<vmem>>, vector<1x128xf32>,
    } else {
    }
    %c128_i32 = arith.constant 128 : i32
    %3 = arith.muli %arg1, %c128_i32 : i32
    %4 = tpu.assume_multiple %3, 128 : i32
    %c0 = arith.constant 0 : index
    %c0_1 = arith.constant 0 : index
    %5 = vector.load %arg9[%c0, %c0_1] : memref<8x128xbf16, #tpu.memory_space<vmem>>, vector<8x128xbf16>
    %c0_2 = arith.constant 0 : index
    %6 = arith.index_cast %4 : i32 to index
    %7 = vector.load %arg9[%c0_2, %6] : memref<8x128xbf16, #tpu.memory_space<vmem>>, vector<8x128xbf16>
    "tpu.trace_start"() <{level = 10 : i32, message = "cq,ck->qk"}> : () -> ()
    %cst = arith.constant dense<0.000000e+00> : vector<128x128xf32>
    %8 = tpu.matmul %7, %5, %cst {dimension_numbers = #tpu.dot_dimension_numbers<[0], [0], [1], [1], [0, 1, 1, 1], [], []>} : vector<8x128xbf16>, vector<8x128xbf16>, vector<128x128xf32> -> vector<128x128xf32>
    "tpu.trace_stop"() : () -> ()
    %cst_3 = arith.constant dense<0xFF800000> : vector<128xf32>
    %9 = vector.multi_reduction <maximumf>, %8, %cst_3 [1] : vector<128x128xf32> to vector<128xf32>
    %10 = vector.shape_cast %9 : vector<128xf32> to vector<128x1xf32>
    %11 = vector.broadcast %10 : vector<128x1xf32> to vector<128x128xf32>
    %12 = arith.subf %8, %11 : vector<128x128xf32>
    %13 = math.exp %12 : vector<128x128xf32>
    %cst_4 = arith.constant dense<0.000000e+00> : vector<128xf32>
    %14 = vector.multi_reduction <add>, %13, %cst_4 [1] : vector<128x128xf32> to vector<128xf32>
    %15 = vector.shape_cast %14 : vector<128xf32> to vector<128x1xf32>
    %16 = tpu.reciprocal %15 {approx = true} : vector<128x1xf32> -> vector<128x1xf32>
    %17 = vector.broadcast %16 : vector<128x1xf32> to vector<128x128xf32>
    %18 = arith.mulf %13, %17 : vector<128x128xf32>
    %c0_5 = arith.constant 0 : index
    %c0_6 = arith.constant 0 : index
    %19 = vector.load %arg12[%c0_5, %c0_6] : memref<1x128xf32, #tpu.memory_space<vmem>>, vector<1x128xf32>
    %cst_7 = arith.constant dense<0.000000e+00> : vector<128xf32>
    %20 = vector.multi_reduction <add>, %18, %cst_7 [0] : vector<128x128xf32> to vector<128xf32>
    %21 = vector.shape_cast %20 : vector<128xf32> to vector<1x128xf32>
    %22 = arith.addf %19, %21 : vector<1x128xf32>
    %c0_8 = arith.constant 0 : index
    %c0_9 = arith.constant 0 : index
    %23 = vector.load %arg12[%c0_8, %c0_9] : memref<1x128xf32, #tpu.memory_space<vmem>>, vector<1x128xf32>
    tpu.vector_store %arg12[%c0_8, %c0_9], %22 {strides = array<i32>} : memref<1x128xf32, #tpu.memory_space<vmem>>, vector<1x128xf32>,
    %c0_10 = arith.constant 0 : index
    %24 = arith.index_cast %4 : i32 to index
    %25 = vector.load %arg10[%c0_10, %24] : memref<32x128xbf16, #tpu.memory_space<vmem>>, vector<32x128xbf16>
    %c0_11 = arith.constant 0 : index
    %c0_12 = arith.constant 0 : index
    %26 = vector.load %arg11[%c0_11, %c0_12] : memref<32x128xf32, #tpu.memory_space<vmem>>, vector<32x128xf32>
    %27 = arith.truncf %18 : vector<128x128xf32> to vector<128x128xbf16>
    %cst_13 = arith.constant dense<0.000000e+00> : vector<32x128xf32>
    %28 = tpu.matmul %25, %27, %cst_13 {dimension_numbers = #tpu.dot_dimension_numbers<[1], [0], [0], [1], [0, 0, 1, 1], [], []>} : vector<32x128xbf16>, vector<128x128xbf16>, vector<32x128xf32> -> vector<32x128xf32>
    %29 = arith.addf %26, %28 : vector<32x128xf32>
    %c0_14 = arith.constant 0 : index
    %c0_15 = arith.constant 0 : index
    %30 = vector.load %arg11[%c0_14, %c0_15] : memref<32x128xf32, #tpu.memory_space<vmem>>, vector<32x128xf32>
    tpu.vector_store %arg11[%c0_14, %c0_15], %29 {strides = array<i32>} : memref<32x128xf32, #tpu.memory_space<vmem>>, vector<32x128xf32>,
    %c0_i32_16 = arith.constant 0 : i32
    %31 = arith.cmpi eq, %arg1, %c0_i32_16 : i32
    %32 = arith.extui %31 : i1 to i32
    %c0_i32_17 = arith.constant 0 : i32
    %33 = arith.cmpi ne, %32, %c0_i32_17 : i32
    scf.if %33 {
      %c0_18 = arith.constant 0 : index
      %c0_19 = arith.constant 0 : index
      %c0_20 = arith.constant 0 : index
      %34 = vector.load %arg2[%c0_18, %c0_19, %c0_20] : memref<1x32x128xf32, #tpu.memory_space<vmem>>, vector<1x32x128xf32>
      %35 = vector.shape_cast %34 : vector<1x32x128xf32> to vector<32x128xf32>
      %c0_21 = arith.constant 0 : index
      %c0_22 = arith.constant 0 : index
      %36 = vector.load %arg11[%c0_21, %c0_22] : memref<32x128xf32, #tpu.memory_space<vmem>>, vector<32x128xf32>
      %c0_23 = arith.constant 0 : index
      %c0_24 = arith.constant 0 : index
      %37 = vector.load %arg12[%c0_23, %c0_24] : memref<1x128xf32, #tpu.memory_space<vmem>>, vector<1x128xf32>
      %cst_25 = arith.constant 9.99999971E-10 : f32
      %38 = vector.broadcast %cst_25 : f32 to vector<1x128xf32>
      %39 = arith.addf %38, %37 : vector<1x128xf32>
      %40 = tpu.reciprocal %39 {approx = true} : vector<1x128xf32> -> vector<1x128xf32>
      %41 = vector.broadcast %40 : vector<1x128xf32> to vector<32x128xf32>
      %42 = arith.mulf %36, %41 : vector<32x128xf32>
      %43 = arith.subf %35, %42 : vector<32x128xf32>
      %c0_26 = arith.constant 0 : index
      %c0_27 = arith.constant 0 : index
      %44 = vector.load %arg6[%c0_26, %c0_27] : memref<32x32xf32, #tpu.memory_space<vmem>>, vector<32x32xf32>
      %cst_28 = arith.constant dense<0.000000e+00> : vector<32x128xf32>
      %45 = tpu.matmul %44, %43, %cst_28 {dimension_numbers = #tpu.dot_dimension_numbers<[1], [0], [0], [1], [0, 0, 1, 1], [], []>} : vector<32x32xf32>, vector<32x128xf32>, vector<32x128xf32> -> vector<32x128xf32>
      %c0_29 = arith.constant 0 : index
      %c0_30 = arith.constant 0 : index
      %46 = vector.load %arg7[%c0_29, %c0_30] : memref<32x1xf32, #tpu.memory_space<vmem>>, vector<32x1xf32>
      %47 = vector.broadcast %46 : vector<32x1xf32> to vector<32x128xf32>
      %48 = arith.addf %45, %47 : vector<32x128xf32>
      %cst_31 = arith.constant 0.000000e+00 : f32
      %49 = vector.broadcast %cst_31 : f32 to vector<32x128xf32>
      %50 = arith.maximumf %48, %49 : vector<32x128xf32>
      %51 = arith.addf %35, %50 : vector<32x128xf32>
      %c0_32 = arith.constant 0 : index
      %c0_33 = arith.constant 0 : index
      %c0_34 = arith.constant 0 : index
      %52 = vector.load %arg8[%c0_32, %c0_33, %c0_34] : memref<1x32x128xf32, #tpu.memory_space<vmem>>, vector<1x32x128xf32>
      %53 = vector.shape_cast %52 : vector<1x32x128xf32> to vector<32x128xf32>
      %54 = vector.shape_cast %51 : vector<32x128xf32> to vector<1x32x128xf32>
      tpu.vector_store %arg8[%c0_32, %c0_33, %c0_34], %54 {strides = array<i32>} : memref<1x32x128xf32, #tpu.memory_space<vmem>>, vector<1x32x128xf32>,
    } else {
    }
    return
  }
  func.func @transform_0(%arg0: i32, %arg1: i32) -> (i32, i32, i32) {
    %c0_i32 = arith.constant 0 : i32
    %c0_i32_0 = arith.constant 0 : i32
    %c0_i32_1 = arith.constant 0 : i32
    return %arg0, %c0_i32, %c0_i32_0 : i32, i32, i32
  }
  func.func @transform_1(%arg0: i32, %arg1: i32) -> (i32, i32) {
    %c0_i32 = arith.constant 0 : i32
    %c0_i32_0 = arith.constant 0 : i32
    %c0_i32_1 = arith.constant 0 : i32
    return %c0_i32, %c0_i32_0 : i32, i32
  }
  func.func @transform_2(%arg0: i32, %arg1: i32) -> (i32, i32) {
    %c0_i32 = arith.constant 0 : i32
    %c0_i32_0 = arith.constant 0 : i32
    %c0_i32_1 = arith.constant 0 : i32
    return %c0_i32, %c0_i32_0 : i32, i32
  }
  func.func @transform_3(%arg0: i32, %arg1: i32) -> (i32, i32) {
    %c0_i32 = arith.constant 0 : i32
    %c0_i32_0 = arith.constant 0 : i32
    %c0_i32_1 = arith.constant 0 : i32
    return %c0_i32, %c0_i32_0 : i32, i32
  }
  func.func @transform_4(%arg0: i32, %arg1: i32) -> (i32, i32) {
    %c0_i32 = arith.constant 0 : i32
    %c0_i32_0 = arith.constant 0 : i32
    %c0_i32_1 = arith.constant 0 : i32
    return %c0_i32, %c0_i32_0 : i32, i32
  }
  func.func @transform_5(%arg0: i32, %arg1: i32) -> (i32, i32) {
    %c0_i32 = arith.constant 0 : i32
    %c0_i32_0 = arith.constant 0 : i32
    %c0_i32_1 = arith.constant 0 : i32
    return %c0_i32, %c0_i32_0 : i32, i32
  }
  func.func @transform_6(%arg0: i32, %arg1: i32) -> (i32, i32, i32) {
    %c0_i32 = arith.constant 0 : i32
    %c0_i32_0 = arith.constant 0 : i32
    %c0_i32_1 = arith.constant 0 : i32
    return %arg0, %c0_i32, %c0_i32_0 : i32, i32, i32
  }
}

</mosaic_0001>

<bundles_post_ra>
// kernel: tpu_custom_call.1
= control target key start
LH: loop header
LB: loop body
LE: loop exit
PB: predicated region body
PF: predicated region fallthrough
CT: control target
= control target key end

     0   :  { %11 = vsyncpa [#allocation7], 0  ;;  %s2141_s0 = inlined_call_operand.vmem [shape: f32[2,32,128], index: 0, kind: input, shape index: {}]   ;;  %s2142_s1 = inlined_call_operand.hbm [shape: f32[8,32], index: 1, kind: input, shape index: {}]   ;;  %s2143_s2 = inlined_call_operand.hbm [shape: f32[32,32], index: 2, kind: input, shape index: {}]   ;;  %s2144_s3 = inlined_call_operand.vmem [shape: f32[32,1], index: 3, kind: input, shape index: {}]   ;;  %s2145_s4 = inlined_call_operand.hbm [shape: f32[32,32], index: 4, kind: input, shape index: {}]   ;;  %s2146_s5 = inlined_call_operand.vmem [shape: f32[32,1], index: 5, kind: input, shape index: {}]   ;;  %s2147_s6 = inlined_call_operand.hbm [shape: f32[2,32,128], index: 6, kind: output, shape index: {}]  }
   0x1   :  { %12 = vsyncpa [#allocation10], 0 }
   0x2   :  { %13 = vsyncpa [#allocation8], 0 }
   0x3   :  { %15 = vsyncpa [#allocation8 + $0x1], 0  ;;  %s1758_s21 = smov 0   ;;  %s1760_s22 = smov 0  }
   0x4   :  { %s1762_s23 = smov 0   ;;  %s1764_s24 = smov 0  }
   0x5   :  { %s1766_s25 = smov 0   ;;  %s1768_s26 = smov 0  }
   0x6 LB: > { %2155 = sst [smem:[#allocation16_spill]] %s1705_s25  ;;  %s1199_s27 = sadd.s32 4294967295, %s1709_s26   ;;  %s1709_s26 = sphi %s1768_s26, %s21_s26   ;;  %s1705_s25 = sphi %s1766_s25, %s2171_s25   ;;  %s1701_s24 = sphi %s1764_s24, %s2170_s24   ;;  %s1697_s23 = sphi %s1762_s23, %s2174_s23   ;;  %s1693_s22 = sphi %s1760_s22, %s2173_s22   ;;  %s1689_s21 = sphi %s1758_s21, %s2172_s21  }
   0x7   : > { %s1200_s28 = sadd.s32 4294967294, %s1709_s26   ;;  %s33_s29 = sadd.s32 1, %s1705_s25 }
   0x8   : > { %s171_s30 = sadd.s32 1, %s1697_s23  ;;  %p35_p0 = scmp.ge.s32.totalorder %s33_s29, 2 }
   0x9   : > { %p181_p1 = scmp.ne.s32.totalorder %s1697_s23, %s1693_s22  ;;  %p182_p2 = scmp.eq.s32.totalorder %s1199_s27, 1 }
   0xa   : > { %p187_p3 = scmp.ne.s32.totalorder %s1693_s22, %s1689_s21  ;;  %s2176_s29 = smov (%p35_p0, %s33_s29), 0 }
   0xb   : > { %2156 = sst [smem:[#allocation17_spill]] %s2176_s29  ;;  %p1798_p4 = por %p182_p2, %p181_p1 }
   0xc   : > { %p188_p5 = scmp.eq.s32.totalorder %s1200_s28, 1  ;;  %s168_s8 = ssub.s32 %s1705_s25, %s2176_s29 }
   0xd   : > { %s2157_s7 = scalar_select %p1798_p4, 1, 0 }
   0xe   : > { %p1201_p6 = scmp.ge.s32.totalorder %s1709_s26, 1  ;;  %p169_p7 = scmp.eq.s32.totalorder %s168_s8, 0 }
   0xf   : > { %p1805_p8 = por %p188_p5, %p187_p3  ;;  %p195_p9 = scmp.lt.s32.totalorder %s1709_s26, 3 }
  0x10   : > { %s1811_s10 = scalar_select %p169_p7, %s1697_s23, %s171_s30  }
  0x11   : > { %s2158_s9 = scalar_select %p1805_p8, 1, 0 }
  0x12   : > { %2159 = sst [smem:[#allocation18_spill]] %s1811_s10  ;;  %p1813_p10 = pnand %p1201_p6, %p195_p9 }
  0x13   : > { %p1817_p11 = scmp.eq.s32.totalorder %s1199_s27, 0  ;;  %s1711_s13 = smov [#allocation9]  }
  0x14   : > { %s2160_s11 = scalar_select %p1813_p10, 1, 0 }
  0x15   : > { %s2161_s12 = scalar_select %p1817_p11, 1, 0 }
  0x16   : > { %p1391_p12 = pneg %p1813_p10  ;;  %s218_s14 = sshll.u32 %s1711_s13, 4  ;;  %s219_s14 = int_to_ptr.vmem [resolvable:$true] %s218_s14 }
  0x17   : > { %s1712_s16 = smov [#allocation6]   ;;  %s1539_s20 = scalar_lea.hbm %s2143_s2, 512 }
  0x18   : > { %p1825_p13 = pnand %p1817_p11, %p1391_p12  ;;  %s208_s17 = sshll.u32 %s1712_s16, 4  ;;  %s209_s17 = int_to_ptr.vmem [resolvable:$true] %s208_s17 }
  0x19   : > { %p1540_p0 = scmp.ne.s32.totalorder %s2143_s2, %s1539_s20  ;;  %p1546_p5 = scmp.lt.u32.totalorder %s1539_s20, %s2143_s2 }
  0x1a   : > { %p1837_p1 = pneg %p1825_p13 }
  0x1c   : > { %p1542_p2 = pnand %p1837_p1, %p1540_p0 }
  0x1e   : > { %p1543_p3 = pneg %p1542_p2 }
  0x20   : > { %p1548_p6 = pnand %p1546_p5, %p1543_p3 }
  0x22   : > { %1551 = shalt.err (!%p1548_p6)
}
  0x23   : > { %s1552_s16 = scalar_lea.vmem %s219_s14, 512  ;;  %p1560_p8 = scmp.lt.s32.totalorder %s219_s14, %s219_s14 }
  0x24   : > { %p1553_p7 = scmp.ne.s32.totalorder %s219_s14, %s1552_s16  ;;  %p1561_p4 = scmp.lt.s32.totalorder %s1552_s16, %s1552_s16 }
  0x26   : > { %p1555_p9 = pnand %p1553_p7, %p1837_p1  ;;  %p1562_p11 = por %p1561_p4, %p1560_p8 }
  0x28   : > { %p1556_p12 = pneg %p1555_p9 }
  0x2a   : > { %p1563_p10 = pnand %p1562_p11, %p1556_p12 }
  0x2c   : > { %1566 = shalt.err (!%p1563_p10)
}
  0x2d   : > { %s2154_s18 = smov 128   ;;  %s1714_s19 = smov 8  }
  0x2e   : > { %1397 = dma.hbm_to_vmem [thread:$0]  (!%p1825_p13), %s2143_s2, 512, %s219_s14, [#allocation10], %s2154_s18, %s2154_s18, %s1714_s19  }
  0x2f   : > { %s1567_s13 = scalar_lea.hbm %s2142_s1, 128 }
  0x30   : > { %p1568_p4 = scmp.ne.s32.totalorder %s2142_s1, %s1567_s13  ;;  %p1574_p11 = scmp.lt.u32.totalorder %s1567_s13, %s2142_s1 }
  0x32   : > { %p1570_p8 = pnand %p1568_p4, %p1837_p1 }
  0x34   : > { %p1571_p10 = pneg %p1570_p8 }
  0x36   : > { %p1576_p0 = pnand %p1574_p11, %p1571_p10 }
  0x38   : > { %1579 = shalt.err (!%p1576_p0)
}
  0x39   : > { %s1580_s20 = scalar_lea.vmem %s209_s17, 128  ;;  %p1588_p6 = scmp.lt.s32.totalorder %s209_s17, %s209_s17 }
  0x3a   : > { %p1581_p2 = scmp.ne.s32.totalorder %s209_s17, %s1580_s20  ;;  %p1589_p7 = scmp.lt.s32.totalorder %s1580_s20, %s1580_s20 }
  0x3c   : > { %p1583_p3 = pnand %p1581_p2, %p1837_p1  ;;  %p1590_p9 = por %p1589_p7, %p1588_p6 }
  0x3e   : > { %p1584_p5 = pneg %p1583_p3 }
  0x40   : > { %p1591_p12 = pnand %p1590_p9, %p1584_p5 }
  0x42   : > { %1594 = shalt.err (!%p1591_p12)
}
  0x43   : > { %1394 = dma.hbm_to_vmem [thread:$0]  (!%p1825_p13), %s2142_s1, 128, %s209_s17, [#allocation7]  }
  0x44   : > { %s1715_s25 = smov [#allocation11]   ;;  %s1595_s8 = scalar_lea.hbm %s2145_s4, 512 }
  0x45   : > { %s234_s10 = sshll.u32 %s1715_s25, 4  ;;  %p1596_p4 = scmp.ne.s32.totalorder %s2145_s4, %s1595_s8  ;;  %s235_s10 = int_to_ptr.vmem [resolvable:$true] %s234_s10 }
  0x46   : > { %p1602_p11 = scmp.lt.u32.totalorder %s1595_s8, %s2145_s4 }
  0x47   : > { %p1598_p8 = pnand %p1596_p4, %p1837_p1 }
  0x49   : > { %p1599_p10 = pneg %p1598_p8 }
  0x4b   : > { %p1604_p0 = pnand %p1602_p11, %p1599_p10 }
  0x4d   : > { %1607 = shalt.err (!%p1604_p0)
}
  0x4e   : > { %s1608_s17 = scalar_lea.vmem %s235_s10, 512  ;;  %p1616_p6 = scmp.lt.s32.totalorder %s235_s10, %s235_s10 }
  0x4f   : > { %p1609_p2 = scmp.ne.s32.totalorder %s235_s10, %s1608_s17  ;;  %p1617_p7 = scmp.lt.s32.totalorder %s1608_s17, %s1608_s17 }
  0x51   : > { %p1611_p3 = pnand %p1609_p2, %p1837_p1  ;;  %p1618_p9 = por %p1617_p7, %p1616_p6 }
  0x53   : > { %p1612_p5 = pneg %p1611_p3 }
  0x55   : > { %p1619_p12 = pnand %p1618_p9, %p1612_p5 }
  0x57   : > { %1622 = shalt.err (!%p1619_p12)
}
  0x58   : > { %s2164_s29 = smov 128   ;;  %p2165_p4 = scmp.ne.s32.totalorder %s2160_s11, 0 }
  0x59   : > { %1400 = dma.hbm_to_vmem [thread:$0]  (!%p1825_p13), %s2145_s4, 512, %s235_s10, [#allocation10], %s2164_s29, %s2164_s29, %s1714_s19  }
  0x5a   : > { %261 = sbr.rel (%p2165_p4) target bundleno = 1495 (0x5d7), region = 44  ;;  %p2166_p1 = scmp.ne.s32.totalorder (!%p2165_p4), %s2161_s12, 0 }
  0x61   : > { %1676 = dma.done.wait (%p2166_p1), [#allocation7], 128  }
  0x62   : > { %1678 = vsyncadd (%p2166_p1), [#allocation7], 4294967168 }
  0x63   : > { %1680 = dma.done.wait (%p2166_p1), [#allocation10], 1024  }
  0x64   : > { %1682 = vsyncadd (%p2166_p1), [#allocation10], 4294966272  ;;  %p299_p8 = scmp.lt.s32.totalorder %s1701_s24, 1  ;;  %v1716_v0 = vmov 0.0|0.0   ;;  %vm1717_vm0 = vmmov 0   ;;  %v1718_v1 = vmov 0.0  }
  0x65   : > { %1354 = vmatprep.subr.bf16.mxu0 %v1716_v0  ;;  %1285 = vmatprep.mubr.msk.f32.mxu0 %vm1717_vm0, %v1718_v1  ;;  %523 = vst [vmem:[#allocation5] sm:$0x1] %v1718_v1  ;;  %v313_v8 = vld [vmem:[#allocation6] sm:$0xff]  ;;  %vm314_vm1 = vcmask 261120   ;;  %vm572_vm2 = vcmask 1043456   ;;  %vm547_vm3 = vcmask 64512  }
  0x66   : > { %s300_s11 = scalar_select %p299_p8, %s1701_s24, 1  ;;  %v390_v23 = vld [vmem:[#allocation9] sm:$0xff]  ;;  %v391_v24 = vld [vmem:[#allocation9 + $0x8] sm:$0xff]  ;;  %v1719_v25 = vmov 0   ;;  %v392_v26 = vld [vmem:[#allocation9 + $0x10] sm:$0xff] }
  0x67   : > { %1296 = vmatprep.mubr.msk.f32.mxu1 %vm314_vm1, %v390_v23  ;;  %1471 = vset.pattern.permute.xlu1 %v1719_v25  ;;  %v393_v27 = vld [vmem:[#allocation9 + $0x18] sm:$0xff]  ;;  %s1236_s28 = sshll.u32 %s1701_s24, 9  ;;  %p2167_p10 = scmp.ne.s32.totalorder %s2157_s7, 0 }
  0x68   : > { %s1235_s15 = sshll.u32 %s300_s11, 5  ;;  %v394_v44 = vld [vmem:[%s2144_s3] sm:$0xff]  ;;  %s2092_s16 = scalar_lea.hbm %s2147_s6, %s1236_s28 }
  0x69   : > { %s303_s25 = scalar_lea.vmem %s2141_s0, %s1235_s15  ;;  %s1720_s17 = smov [#allocation12]  }
  0x6a   : > { %v1910_v2 = vld [vmem:[%s303_s25] sm:$0xff]  ;;  %v1912_v3 = vld [vmem:[%s303_s25 + $0x8] sm:$0xff]  ;;  %v1914_v4 = vld [vmem:[%s303_s25 + $0x10] sm:$0xff]  ;;  %s1627_s29 = sshll.u32 %s1720_s17, 4  ;;  %s1628_s29 = int_to_ptr.vmem [resolvable:$false] %s1627_s29 }
  0x6b   : > { %v1355_v5 = vpack.c.bf16 %v1912_v3, %v1910_v2  ;;  %v1918_v6 = vld [vmem:[%s303_s25 + $0x18] sm:$0xff]  ;;  %s296_s25 = sand.u32 1, %s1693_s22   ;;  %s1629_s18 = scalar_lea.vmem %s1628_s29, 1024 }
  0x6c   : > { %v1358_v7 = vpack.c.bf16 %v1918_v6, %v1914_v4  ;;  %s1210_s12 = sshll.u32 %s296_s25, 5  ;;  %s2095_s24 = scalar_lea.sflag [#allocation8], %s296_s25 }
  0x6d   : > { %1356 = vmatpush3.bf16.msra.mxu0 %v1355_v5  ;;  %1361 = vmatprep.subr.bf16.mxu1 %v1355_v5  ;;  %s298_s10 = scalar_lea.vmem [#allocation12], %s1210_s12 }
  0x6e   : > { %1357 = vmatprep.subr.bf16.mxu0 %v1716_v0  ;;  %1363 = vmatpush3.bf16.msra.mxu1 %v1355_v5  ;;  %s1094_s27 = sshll.u32 %s298_s10, 4  ;;  %s2086_s27 = int_to_ptr.vmem [resolvable:$true] %s1094_s27 }
  0x6f   : > { %1365 = vmatprep.subr.bf16.mxu1 %v1358_v7  ;;  %s1623_s20 = scalar_lea.vmem %s2086_s27, 512  ;;  %p1630_p2 = scmp.lt.s32.totalorder %s2086_s27, %s1628_s29 }
  0x70   : > { %p1624_p13 = scmp.ne.s32.totalorder %s2086_s27, %s1623_s20  ;;  %p1631_p3 = scmp.lt.s32.totalorder %s1629_s18, %s1623_s20 }
  0x71   : > { %1359 = vmatpush3.bf16.msra.mxu0 %v1358_v7 }
  0x72   : > { %1367 = vmatpush3.bf16.msra.mxu1 %v1358_v7  ;;  %p1625_p11 = pnand %p1624_p13, %p2167_p10  ;;  %p1632_p5 = por %p1631_p3, %p1630_p2 }
  0x74   : > { %1286 = vmatmul.mubr.msk.f32.vlgmr.msra.gmra.mrb[0].mxu0 %vm314_vm1, %v313_v8  ;;  %p1626_p0 = pneg %p1625_p11 }
  0x75   : > { %1297 = vmatmul.mubr.msk.f32.vlgmr.msra.gmra.mrb[0].mxu1 %vm314_vm1, %v391_v24 }
  0x76   : > { %1299 = vmatprep.mubr.msk.f32.mxu1 %vm314_vm1, %v392_v26  ;;  %p1633_p6 = pnand %p1632_p5, %p1626_p0 }
  0x79   : > { %1300 = vmatmul.mubr.msk.f32.gmra.mrb[2].mxu1 %vm314_vm1, %v393_v27 }
 0x147   : > { %v384_v9 = vpop.f32.mrb[0].mxu0 }
 0x148   : > { %v388_v10 = vpack.c.bf16 %v384_v9, %v384_v9  ;;  %v1287_v11 = vpop.f32.mrb[1].mxu0  ;;  %v1965_v45 = vpop.f32.mrb[0].mxu1 }
 0x149   : > { %v1967_v46 = vpop.f32.mrb[1].mxu1 }
 0x14a   : > { %389 = vst [vmem:[#allocation2] sm:$0xf] %v388_v10 }
 0x151   : > { %v530_v12 = vld [vmem:[#allocation2] sm:$0xf] }
 0x152   : > { %v525_v13 = vld [vmem:[#allocation2] sm:$0xf]  ;;  %531 = vxpose.xlu0.c.b16.start.end [1/1] (short) %v530_v12, 128 }
 0x153   : > { %1376 = vmatprep.subr.msk.bf16.mxu0 %vm572_vm2, %v525_v13  ;;  %v574_v14 = vsel %vm572_vm2, %v525_v13, 0 }
 0x154   : > { %1303 = vmatpush3.bf16.msra.mxu0 %v574_v14 }
 0x15b   : > { %1472 = vset.pattern.permute.xlu0 %v1719_v25 }
 0x1b8   : > { %v539_v15 = vpop.trf.xlu0 }
 0x1b9   : > { %1304 = vmatprep.mubr.msk.bf16.mxu0 %vm547_vm3, %v539_v15 }
 0x1bc   : > { %v540_v16 = vpop.trf.xlu0 }
 0x1bd   : > { %1305 = vmatmul.mubr.msk.bf16.vlgmr.msra.gmra.mrb[4].mxu0 %vm547_vm3, %v540_v16 }
 0x1c0   : > { %v541_v17 = vpop.trf.xlu0 }
 0x1c1   : > { %1308 = vmatprep.mubr.msk.bf16.mxu0 %vm547_vm3, %v541_v17 }
 0x1c4   : > { %v542_v18 = vpop.trf.xlu0 }
 0x1c5   : > { %1309 = vmatmul.mubr.msk.bf16.gmra.mrb[8].mxu0 %vm547_vm3, %v542_v18 }
 0x1c8   : > { %v543_v19 = vpop.trf.xlu0 }
 0x1c9   : > { %1312 = vmatprep.mubr.msk.bf16.mxu0 %vm547_vm3, %v543_v19 }
 0x1cc   : > { %v544_v20 = vpop.trf.xlu0 }
 0x1cd   : > { %1313 = vmatmul.mubr.msk.bf16.gmra.mrb[12].mxu0 %vm547_vm3, %v544_v20 }
 0x1d0   : > { %v545_v21 = vpop.trf.xlu0 }
 0x1d1   : > { %1316 = vmatprep.mubr.msk.bf16.mxu0 %vm547_vm3, %v545_v21 }
 0x1d4   : > { %v546_v22 = vpop.trf.xlu0 }
 0x1d5   : > { %1317 = vmatmul.mubr.msk.bf16.gmra.mrb[16].mxu0 %vm547_vm3, %v546_v22 }
 0x290   : > { %v1306_v28 = vpop.f32.mrb[4].mxu0 }
 0x291   : > { %677 = vmax.xlane.f32.xlu1 %v1306_v28  ;;  %v610_v29 = vpop.f32.mrb[5].mxu0 }
 0x292   : > { %673 = vmax.xlane.f32.xlu0 %v610_v29  ;;  %v1307_v30 = vpop.f32.mrb[6].mxu0 }
 0x293   : > { %v613_v31 = vpop.f32.mrb[7].mxu0 }
 0x295   : > { %679 = vmax.xlane.f32.xlu1 %v1307_v30 }
 0x298   : > { %v1310_v32 = vpop.f32.mrb[8].mxu0 }
 0x299   : > { %675 = vmax.xlane.f32.xlu1 %v613_v31  ;;  %v626_v33 = vpop.f32.mrb[9].mxu0 }
 0x29a   : > { %v1311_v34 = vpop.f32.mrb[10].mxu0 }
 0x29b   : > { %v1935_v35 = vpop.f32.mrb[11].mxu0 }
 0x29d   : > { %685 = vmax.xlane.f32.xlu1 %v1310_v32 }
 0x2a0   : > { %v1937_v36 = vpop.f32.mrb[12].mxu0 }
 0x2a1   : > { %681 = vmax.xlane.f32.xlu1 %v626_v33  ;;  %v1939_v37 = vpop.f32.mrb[13].mxu0 }
 0x2a2   : > { %v1941_v38 = vpop.f32.mrb[14].mxu0 }
 0x2a3   : > { %v1943_v39 = vpop.f32.mrb[15].mxu0 }
 0x2a5   : > { %687 = vmax.xlane.f32.xlu1 %v1311_v34 }
 0x2a8   : > { %v1945_v40 = vpop.f32.mrb[16].mxu0 }
 0x2a9   : > { %683 = vmax.xlane.f32.xlu1 %v1935_v35  ;;  %v1948_v41 = vpop.f32.mrb[17].mxu0 }
 0x2aa   : > { %v1950_v42 = vpop.f32.mrb[18].mxu0 }
 0x2ab   : > { %v1952_v43 = vpop.f32.mrb[19].mxu0 }
 0x2ac   : > { %699 = vmax.xlane.f32.xlu0 %v1952_v43 }
 0x2ad   : > { %693 = vmax.xlane.f32.xlu1 %v1937_v36 }
 0x2b0   : > { %703 = vmax.xlane.f32.xlu0 %v1950_v42 }
 0x2b1   : > { %689 = vmax.xlane.f32.xlu1 %v1939_v37 }
 0x2b5   : > { %695 = vmax.xlane.f32.xlu1 %v1941_v38 }
 0x2b9   : > { %691 = vmax.xlane.f32.xlu1 %v1943_v39 }
 0x2bd   : > { %701 = vmax.xlane.f32.xlu1 %v1945_v40 }
 0x2c1   : > { %697 = vmax.xlane.f32.xlu1 %v1948_v41 }
 0x2d2   : > { %400 = vperm.xlu1 %1471, %v394_v44  }
 0x31e   : > { %v678_v47 = vpop.xlane.xlu1 %677 }
 0x31f   : > { %v707_v48 = vsub.f32 %v1306_v28, %v678_v47  ;;  %v674_v49 = vpop.xlane.xlu0 %673 }
 0x320   : > { %v705_v50 = vsub.f32 %v610_v29, %v674_v49 }
 0x321   : > { %v725_v51 = vmul.f32 1.442695, %v707_v48 }
 0x322   : > { %v721_v52 = vmul.f32 1.442695, %v705_v50  ;;  %v680_v53 = vpop.xlane.xlu1 %679 }
 0x323   : > { %1473 = vpow2.f32 %v725_v51  ;;  %v708_v54 = vsub.f32 %v1307_v30, %v680_v53  ;;  %v396_v53 = vld [vmem:[%s2144_s3 + $0x10] sm:$0xff] }
 0x324   : > { %1475 = vpow2.f32 %v721_v52 }
 0x325   : > { %v727_v55 = vmul.f32 1.442695, %v708_v54  ;;  %v2029_v54 = vpop.f32.mrb[2].mxu1 }
 0x326   : > { %v676_v56 = vpop.xlane.xlu1 %675 }
 0x327   : > { %1477 = vpow2.f32 %v727_v55  ;;  %v706_v57 = vsub.f32 %v613_v31, %v676_v56  ;;  %v2031_v55 = vpop.f32.mrb[3].mxu1  ;;  %v397_v56 = vld [vmem:[%s2144_s3 + $0x18] sm:$0xff] }
 0x329   : > { %v723_v58 = vmul.f32 1.442695, %v706_v57  ;;  %v395_v57 = vld [vmem:[%s2144_s3 + $0x8] sm:$0xff] }
 0x32a   : > { %v686_v59 = vpop.xlane.xlu1 %685 }
 0x32b   : > { %1479 = vpow2.f32 %v723_v58  ;;  %v711_v60 = vsub.f32 %v1310_v32, %v686_v59  ;;  %v946_v58 = vld [vmem:[%s2146_s5] sm:$0xff]  ;;  %v947_v59 = vld [vmem:[%s2146_s5 + $0x8] sm:$0xff] }
 0x32d   : > { %v1969_v61 = vpop.eup %1473  ;;  %v733_v62 = vmul.f32 1.442695, %v711_v60  ;;  %v948_v60 = vld [vmem:[%s2146_s5 + $0x10] sm:$0xff] }
 0x32e   : > { %v682_v63 = vpop.xlane.xlu1 %681  ;;  %757 = vadd.xlane.f32.xlu1 %v1969_v61  ;;  %v1972_v1 = vpop.eup %1475 }
 0x32f   : > { %1481 = vpow2.f32 %v733_v62  ;;  %v709_v0 = vsub.f32 %v626_v33, %v682_v63  ;;  %v949_v62 = vld [vmem:[%s2146_s5 + $0x18] sm:$0xff] }
 0x331   : > { %v1974_v5 = vpop.eup %1477  ;;  %v729_v7 = vmul.f32 1.442695, %v709_v0 }
 0x332   : > { %v688_v8 = vpop.xlane.xlu1 %687  ;;  %753 = vadd.xlane.f32.xlu1 %v1972_v1  ;;  %759 = vadd.xlane.f32.xlu0 %v1974_v5 }
 0x333   : > { %1483 = vpow2.f32 %v729_v7  ;;  %v712_v9 = vsub.f32 %v1311_v34, %v688_v8 }
 0x335   : > { %v1978_v10 = vpop.eup %1479  ;;  %v735_v11 = vmul.f32 1.442695, %v712_v9 }
 0x336   : > { %v684_v12 = vpop.xlane.xlu1 %683  ;;  %755 = vadd.xlane.f32.xlu0 %v1978_v10 }
 0x337   : > { %1485 = vpow2.f32 %v735_v11  ;;  %v710_v13 = vsub.f32 %v1935_v35, %v684_v12 }
 0x339   : > { %v1982_v14 = vpop.eup %1481  ;;  %v731_v15 = vmul.f32 1.442695, %v710_v13  ;;  %v700_v19 = vpop.xlane.xlu0 %699 }
 0x33a   : > { %v694_v16 = vpop.xlane.xlu1 %693  ;;  %765 = vadd.xlane.f32.xlu1 %v1982_v14  ;;  %v718_v35 = vsub.f32 %v1952_v43, %v700_v19 }
 0x33b   : > { %1487 = vpow2.f32 %v731_v15  ;;  %v715_v17 = vsub.f32 %v1937_v36, %v694_v16 }
 0x33c   : > { %v747_v47 = vmul.f32 1.442695, %v718_v35 }
 0x33d   : > { %v1986_v18 = vpop.eup %1483  ;;  %v741_v20 = vmul.f32 1.442695, %v715_v17  ;;  %v704_v26 = vpop.xlane.xlu0 %703 }
 0x33e   : > { %v690_v21 = vpop.xlane.xlu1 %689  ;;  %761 = vadd.xlane.f32.xlu1 %v1986_v18  ;;  %v720_v30 = vsub.f32 %v1950_v42, %v704_v26 }
 0x33f   : > { %1489 = vpow2.f32 %v741_v20  ;;  %v713_v22 = vsub.f32 %v1939_v37, %v690_v21 }
 0x340   : > { %v751_v36 = vmul.f32 1.442695, %v720_v30 }
 0x341   : > { %v1990_v23 = vpop.eup %1485  ;;  %v737_v24 = vmul.f32 1.442695, %v713_v22 }
 0x342   : > { %v696_v25 = vpop.xlane.xlu1 %695  ;;  %767 = vadd.xlane.f32.xlu0 %v1990_v23 }
 0x343   : > { %1491 = vpow2.f32 %v737_v24  ;;  %v716_v27 = vsub.f32 %v1941_v38, %v696_v25 }
 0x345   : > { %v1994_v28 = vpop.eup %1487  ;;  %v743_v29 = vmul.f32 1.442695, %v716_v27 }
 0x346   : > { %v692_v31 = vpop.xlane.xlu1 %691  ;;  %763 = vadd.xlane.f32.xlu0 %v1994_v28 }
 0x347   : > { %1493 = vpow2.f32 %v743_v29  ;;  %v714_v32 = vsub.f32 %v1943_v39, %v692_v31 }
 0x349   : > { %v1999_v33 = vpop.eup %1489  ;;  %v739_v34 = vmul.f32 1.442695, %v714_v32 }
 0x34a   : > { %v702_v37 = vpop.xlane.xlu1 %701  ;;  %773 = vadd.xlane.f32.xlu1 %v1999_v33 }
 0x34b   : > { %1495 = vpow2.f32 %v739_v34  ;;  %v719_v38 = vsub.f32 %v1945_v40, %v702_v37 }
 0x34c   : > { %1497 = vpow2.f32 %v751_v36 }
 0x34d   : > { %v2004_v44 = vpop.eup %1491  ;;  %v749_v42 = vmul.f32 1.442695, %v719_v38 }
 0x34e   : > { %769 = vadd.xlane.f32.xlu1 %v2004_v44  ;;  %v698_v39 = vpop.xlane.xlu1 %697 }
 0x34f   : > { %1499 = vpow2.f32 %v749_v42  ;;  %v717_v48 = vsub.f32 %v1948_v41, %v698_v39 }
 0x350   : > { %1501 = vpow2.f32 %v747_v47 }
 0x351   : > { %v2008_v49 = vpop.eup %1493  ;;  %v745_v43 = vmul.f32 1.442695, %v717_v48 }
 0x352   : > { %775 = vadd.xlane.f32.xlu0 %v2008_v49  ;;  %v2051_v63 = vpop.permute.xlu1 %400 }
 0x353   : > { %1503 = vpow2.f32 %v745_v43 }
 0x355   : > { %v2011_v50 = vpop.eup %1495 }
 0x356   : > { %771 = vadd.xlane.f32.xlu0 %v2011_v50  ;;  %v2014_v40 = vpop.eup %1497 }
 0x359   : > { %v2016_v51 = vpop.eup %1499 }
 0x35a   : > { %781 = vadd.xlane.f32.xlu1 %v2016_v51  ;;  %783 = vadd.xlane.f32.xlu0 %v2014_v40  ;;  %v2020_v41 = vpop.eup %1501 }
 0x35d   : > { %v2022_v52 = vpop.eup %1503 }
 0x35e   : > { %777 = vadd.xlane.f32.xlu1 %v2022_v52  ;;  %779 = vadd.xlane.f32.xlu0 %v2020_v41 }
 0x36f   : > { %410 = vperm.xlu1 %1471, %v396_v53  }
 0x373   : > { %415 = vperm.xlu1 %1471, %v397_v56  }
 0x374   : > { %405 = vperm.xlu0 %1472, %v395_v57  }
 0x377   : > { %952 = vperm.xlu1 %1471, %v946_v58  }
 0x37b   : > { %957 = vperm.xlu1 %1471, %v947_v59  }
 0x37f   : > { %962 = vperm.xlu1 %1471, %v948_v60  }
 0x383   : > { %967 = vperm.xlu1 %1471, %v949_v62  }
 0x3bb   : > { %v758_v0 = vpop.xlane.xlu1 %757 }
 0x3bf   : > { %v754_v7 = vpop.xlane.xlu1 %753  ;;  %v760_v8 = vpop.xlane.xlu0 %759 }
 0x3c0   : > { %1505 = vrcp.f32 %v754_v7 }
 0x3c1   : > { %1507 = vrcp.f32 %v760_v8 }
 0x3c2   : > { %1509 = vrcp.f32 %v758_v0 }
 0x3c3   : > { %v756_v9 = vpop.xlane.xlu0 %755 }
 0x3c4   : > { %1511 = vrcp.f32 %v756_v9 }
 0x3c7   : > { %v766_v11 = vpop.xlane.xlu1 %765 }
 0x3ca   : > { %v1506_v12 = vpop.eup %1505 }
 0x3cb   : > { %v1508_v13 = vpop.eup %1507  ;;  %v762_v17 = vpop.xlane.xlu1 %761  ;;  %v801_v20 = vmul.f32 %v1506_v12, %v1972_v1 }
 0x3cc   : > { %v1510_v15 = vpop.eup %1509  ;;  %v804_v22 = vmul.f32 %v1508_v13, %v1974_v5  ;;  %1513 = vrcp.f32 %v762_v17 }
 0x3cd   : > { %v803_v25 = vmul.f32 %v1510_v15, %v1969_v61 }
 0x3ce   : > { %v1512_v16 = vpop.eup %1511 }
 0x3cf   : > { %v768_v19 = vpop.xlane.xlu0 %767  ;;  %v802_v21 = vmul.f32 %v1512_v16, %v1978_v10  ;;  %v850_v27 = vpack.c.bf16 %v804_v22, %v803_v25 }
 0x3d0   : > { %1515 = vrcp.f32 %v768_v19 }
 0x3d1   : > { %v849_v24 = vpack.c.bf16 %v802_v21, %v801_v20  ;;  %1517 = vrcp.f32 %v766_v11  ;;  %v818_v30 = vadd.f32 %v802_v21, %v801_v20  ;;  %v497_v21 = vadd.f32 %v1967_v46, %v2051_v63 }
 0x3d3   : > { %1320 = vmatprep.subr.bf16.mxu1 %v849_v24  ;;  %v764_v26 = vpop.xlane.xlu0 %763  ;;  %v819_v5 = vadd.f32 %v818_v30, %v803_v25 }
 0x3d4   : > { %1519 = vrcp.f32 %v764_v26  ;;  %1321 = vmatpush3.bf16.msra.mxu1 %v849_v24 }
 0x3d5   : > { %1322 = vmatprep.subr.bf16.mxu1 %v850_v27  ;;  %v820_v38 = vadd.f32 %v819_v5, %v804_v22 }
 0x3d6   : > { %v1514_v1 = vpop.eup %1513 }
 0x3d7   : > { %v774_v29 = vpop.xlane.xlu1 %773  ;;  %v805_v61 = vmul.f32 %v1514_v1, %v1986_v18 }
 0x3d8   : > { %1323 = vmatpush3.bf16.msra.mxu1 %v850_v27 }
 0x3d9   : > { %v821_v39 = vadd.f32 %v820_v38, %v805_v61 }
 0x3da   : > { %v1516_v10 = vpop.eup %1515 }
 0x3db   : > { %v770_v31 = vpop.xlane.xlu1 %769  ;;  %v1518_v32 = vpop.eup %1517  ;;  %v808_v37 = vmul.f32 %v1516_v10, %v1990_v23 }
 0x3dc   : > { %1521 = vrcp.f32 %v770_v31  ;;  %v807_v47 = vmul.f32 %v1518_v32, %v1982_v14 }
 0x3de   : > { %v1520_v34 = vpop.eup %1519  ;;  %v852_v43 = vpack.c.bf16 %v808_v37, %v807_v47 }
 0x3df   : > { %v776_v35 = vpop.xlane.xlu0 %775  ;;  %v806_v36 = vmul.f32 %v1520_v34, %v1994_v28 }
 0x3e0   : > { %1523 = vrcp.f32 %v776_v35 }
 0x3e1   : > { %v851_v42 = vpack.c.bf16 %v806_v36, %v805_v61  ;;  %1525 = vrcp.f32 %v774_v29  ;;  %v822_v53 = vadd.f32 %v821_v39, %v806_v36  ;;  %v817_v61 = vld [vmem:[#allocation5] sm:$0x1] }
 0x3e3   : > { %1324 = vmatprep.subr.bf16.mxu1 %v851_v42  ;;  %v772_v48 = vpop.xlane.xlu0 %771  ;;  %v823_v28 = vadd.f32 %v822_v53, %v807_v47 }
 0x3e4   : > { %1527 = vrcp.f32 %v772_v48  ;;  %1325 = vmatpush3.bf16.msra.mxu1 %v851_v42  ;;  %v929_v42 = vlaneseq }
 0x3e5   : > { %1326 = vmatprep.subr.bf16.mxu1 %v852_v43  ;;  %v824_v62 = vadd.f32 %v823_v28, %v808_v37 }
 0x3e6   : > { %v1522_v57 = vpop.eup %1521  ;;  %v930_v47 = vshrl.u32 %v929_v42, 7 }
 0x3e7   : > { %v782_v56 = vpop.xlane.xlu1 %781  ;;  %v784_v18 = vpop.xlane.xlu0 %783  ;;  %v809_v14 = vmul.f32 %v1522_v57, %v2004_v44 }
 0x3e8   : > { %1327 = vmatpush3.bf16.msra.mxu1 %v852_v43  ;;  %1529 = vrcp.f32 %v782_v56  ;;  %v931_v39 = vsub.s32 0, %v930_v47 }
 0x3e9   : > { %1531 = vrcp.f32 %v784_v18  ;;  %v825_v9 = vadd.f32 %v824_v62, %v809_v14 }
 0x3ea   : > { %v1524_v59 = vpop.eup %1523 }
 0x3eb   : > { %v778_v23 = vpop.xlane.xlu1 %777  ;;  %v780_v58 = vpop.xlane.xlu0 %779  ;;  %v812_v11 = vmul.f32 %v1524_v59, %v2008_v49 }
 0x3ec   : > { %1533 = vrcp.f32 %v778_v23  ;;  %v1526_v60 = vpop.eup %1525 }
 0x3ed   : > { %1535 = vrcp.f32 %v780_v58  ;;  %v811_v15 = vmul.f32 %v1526_v60, %v1999_v33 }
 0x3ee   : > { %v1528_v0 = vpop.eup %1527 }
 0x3ef   : > { %v411_v7 = vpop.permute.xlu1 %410  ;;  %v810_v8 = vmul.f32 %v1528_v0, %v2011_v50  ;;  %v854_v19 = vpack.c.bf16 %v812_v11, %v811_v15 }
 0x3f0   : > { %v507_v22 = vadd.f32 %v2031_v55, %v411_v7 }
 0x3f1   : > { %v826_v12 = vadd.f32 %v825_v9, %v810_v8  ;;  %v853_v13 = vpack.c.bf16 %v810_v8, %v809_v14  ;;  %v943_v9 = vld [vmem:[#allocation11 + $0x8] sm:$0xff] }
 0x3f2   : > { %v1530_v20 = vpop.eup %1529 }
 0x3f3   : > { %v416_v16 = vpop.permute.xlu1 %415  ;;  %1328 = vmatprep.subr.bf16.mxu1 %v853_v13  ;;  %v406_v17 = vpop.permute.xlu0 %405  ;;  %v827_v44 = vadd.f32 %v826_v12, %v811_v15  ;;  %v815_v55 = vmul.f32 %v1530_v20, %v2016_v51  ;;  %v945_v12 = vld [vmem:[#allocation11 + $0x18] sm:$0xff] }
 0x3f4   : > { %v512_v50 = vadd.f32 %v2029_v54, %v416_v16  ;;  %v502_v24 = vadd.f32 %v1965_v45, %v406_v17  ;;  %1329 = vmatpush3.bf16.msra.mxu1 %v853_v13  ;;  %v1532_v49 = vpop.eup %1531 }
 0x3f5   : > { %1330 = vmatprep.subr.bf16.mxu1 %v854_v19  ;;  %v828_v29 = vadd.f32 %v827_v44, %v812_v11  ;;  %v816_v54 = vmul.f32 %v1532_v49, %v2014_v40  ;;  %v942_v40 = vld [vmem:[#allocation11] sm:$0xff]  ;;  %v944_v11 = vld [vmem:[#allocation11 + $0x10] sm:$0xff] }
 0x3f6   : > { %v1534_v25 = vpop.eup %1533  ;;  %v516_v33 = vpack.c.bf16 %v512_v50, %v507_v22  ;;  %v515_v26 = vpack.c.bf16 %v502_v24, %v497_v21  ;;  %1348 = vmatprep.mubr.msk.f32.mxu0 %vm314_vm1, %v942_v40 }
 0x3f7   : > { %v1536_v27 = vpop.eup %1535  ;;  %v813_v30 = vmul.f32 %v1534_v25, %v2022_v52  ;;  %v856_v31 = vpack.c.bf16 %v816_v54, %v815_v55  ;;  %v953_v13 = vpop.permute.xlu1 %952 }
 0x3f8   : > { %1331 = vmatpush3.bf16.msra.mxu1 %v854_v19  ;;  %1336 = vmatprep.mubr.bf16.mxu1 %v515_v26  ;;  %v814_v46 = vmul.f32 %v1536_v27, %v2020_v41 }
 0x3f9   : > { %v829_v63 = vadd.f32 %v828_v29, %v813_v30 }
 0x3fa   : > { %v855_v45 = vpack.c.bf16 %v814_v46, %v813_v30 }
 0x3fb   : > { %v830_v1 = vadd.f32 %v829_v63, %v814_v46  ;;  %v958_v15 = vpop.permute.xlu1 %957 }
 0x3fc   : > { %1332 = vmatprep.subr.bf16.mxu1 %v855_v45 }
 0x3fd   : > { %1333 = vmatpush3.bf16.msra.mxu1 %v855_v45  ;;  %v831_v10 = vadd.f32 %v830_v1, %v815_v55 }
 0x3fe   : > { %1334 = vmatprep.subr.bf16.mxu1 %v856_v31 }
 0x3ff   : > { %v832_v32 = vadd.f32 %v831_v10, %v816_v54  ;;  %v963_v16 = vpop.permute.xlu1 %962 }
 0x401   : > { %v833_v5 = vrot.slane %v832_v32, 4  ;;  %1335 = vmatpush3.bf16.msra.mxu1 %v856_v31 }
 0x403   : > { %v834_v52 = vadd.f32 %v833_v5, %v832_v32  ;;  %v968_v22 = vpop.permute.xlu1 %967 }
 0x404   : > { %1337 = vmatmul.mubr.bf16.vlgmr.msra.gmra.mrb[4].mxu1 %v516_v33 }
 0x405   : > { %v835_v34 = vrot.slane %v834_v52, 2 }
 0x407   : > { %v836_v35 = vadd.f32 %v835_v34, %v834_v52 }
 0x409   : > { %v837_v41 = vrot.slane %v836_v35, 1 }
 0x40b   : > { %v838_v51 = vadd.f32 %v837_v41, %v836_v35 }
 0x40d   : > { %v839_v36 = vadd.f32 %v838_v51, %v817_v61 }
 0x40f   : > { %840 = vst [vmem:[#allocation5] sm:$0x1] %v839_v36 }
 0x416   : > { %v925_v37 = vld [vmem:[#allocation5] sm:$0x1] }
 0x417   : > { %v926_v38 = vadd.f32 1e-09, %v925_v37 }
 0x419   : > { %1537 = vrcp.f32 %v926_v38 }
 0x423   : > { %v1538_v48 = vpop.eup %1537 }
 0x424   : > { %v932_v43 = vrot.slane %v1538_v48, %v931_v39 }
 0x4d7   : > { %v1338_v53 = vpop.f32.mrb[4].mxu1 }
 0x4d8   : > { %v936_v56 = vmul.f32 %v1338_v53, %v932_v43  ;;  %v891_v18 = vpop.f32.mrb[5].mxu1 }
 0x4d9   : > { %v934_v57 = vmul.f32 %v932_v43, %v891_v18  ;;  %v1339_v28 = vpop.f32.mrb[6].mxu1 }
 0x4da   : > { %v937_v23 = vmul.f32 %v1339_v28, %v932_v43  ;;  %v894_v58 = vpop.f32.mrb[7].mxu1  ;;  %v940_v59 = vsub.f32 %v1914_v4, %v936_v56 }
 0x4db   : > { %v935_v14 = vmul.f32 %v932_v43, %v894_v58  ;;  %v938_v62 = vsub.f32 %v1910_v2, %v934_v57 }
 0x4dc   : > { %v941_v60 = vsub.f32 %v1918_v6, %v937_v23 }
 0x4dd   : > { %v939_v0 = vsub.f32 %v1912_v3, %v935_v14 }
 0x4de   : > { %v1372_v7 = vpack.c.bf16 %v941_v60, %v940_v59 }
 0x4df   : > { %v1368_v8 = vpack.c.bf16 %v939_v0, %v938_v62 }
 0x4e1   : > { %1369 = vmatprep.subr.bf16.mxu0 %v1368_v8 }
 0x4e2   : > { %1371 = vmatpush3.bf16.msra.mxu0 %v1368_v8 }
 0x4e3   : > { %1373 = vmatprep.subr.bf16.mxu0 %v1372_v7 }
 0x4e6   : > { %1375 = vmatpush3.bf16.msra.mxu0 %v1372_v7 }
 0x4e9   : > { %1349 = vmatmul.mubr.msk.f32.vlgmr.msra.gmra.mrb[2].mxu0 %vm314_vm1, %v943_v9 }
 0x4ea   : > { %1351 = vmatprep.mubr.msk.f32.mxu0 %vm314_vm1, %v944_v11 }
 0x4ed   : > { %1352 = vmatmul.mubr.msk.f32.gmra.mrb[20].mxu0 %vm314_vm1, %v945_v12 }
 0x5bc   : > { %v1350_v17 = vpop.f32.mrb[2].mxu0 }
 0x5bd   : > { %v1055_v44 = vadd.f32 %v1350_v17, %v958_v15  ;;  %v1049_v19 = vpop.f32.mrb[3].mxu0 }
 0x5be   : > { %v1050_v20 = vadd.f32 %v1049_v19, %v953_v13 }
 0x5bf   : > { %v1069_v21 = vmax.f32 %v1055_v44, 0.0 }
 0x5c0   : > { %v1068_v50 = vmax.f32 %v1050_v20, 0.0  ;;  %v1353_v24 = vpop.f32.mrb[20].mxu0 }
 0x5c1   : > { %v1073_v49 = vadd.f32 %v1069_v21, %v1912_v3  ;;  %v1065_v25 = vadd.f32 %v1353_v24, %v968_v22  ;;  %v1059_v33 = vpop.f32.mrb[21].mxu0 }
 0x5c2   : > { %v1072_v26 = vadd.f32 %v1068_v50, %v1910_v2  ;;  %v1060_v27 = vadd.f32 %v1059_v33, %v963_v16 }
 0x5c3   : > { %1077 = vst [vmem:[%s298_s10 + $0x8] sm:$0xff] %v1073_v49  ;;  %v1071_v29 = vmax.f32 %v1065_v25, 0.0 }
 0x5c4   : > { %1076 = vst [vmem:[%s298_s10] sm:$0xff] %v1072_v26  ;;  %v1070_v30 = vmax.f32 %v1060_v27, 0.0 }
 0x5c5   : > { %v1075_v3 = vadd.f32 %v1071_v29, %v1918_v6 }
 0x5c6   : > { %v1074_v2 = vadd.f32 %v1070_v30, %v1914_v4 }
 0x5c7   : > { %1079 = vst [vmem:[%s298_s10 + $0x18] sm:$0xff] %v1075_v3 }
 0x5c8   : > { %1078 = vst [vmem:[%s298_s10 + $0x10] sm:$0xff] %v1074_v2 }
 0x5c9   : > { %1636 = shalt.err (!%p1633_p6)
}
 0x5ca   : > { %s1637_s14 = scalar_lea.hbm %s2092_s16, 512  ;;  %s1641_s30 = scalar_lea.hbm %s2147_s6, 1024 }
 0x5cb   : > { %p1638_p7 = scmp.ne.s32.totalorder %s2092_s16, %s1637_s14  ;;  %p1642_p4 = scmp.lt.u32.totalorder %s2092_s16, %s2147_s6 }
 0x5cc   : > { %p1643_p1 = scmp.lt.u32.totalorder %s1641_s30, %s1637_s14  ;;  %p1645_p13 = scmp.lt.u32.totalorder %s1637_s14, %s2092_s16 }
 0x5cd   : > { %p1639_p9 = pnand %p1638_p7, %p2167_p10 }
 0x5ce   : > { %p1644_p8 = por %p1643_p1, %p1642_p4 }
 0x5cf   : > { %p1640_p12 = pneg %p1639_p9 }
 0x5d0   : > { %p1646_p11 = por %p1645_p13, %p1644_p8 }
 0x5d2   : > { %p1647_p0 = pnand %p1646_p11, %p1640_p12 }
 0x5d4   : > { %1650 = shalt.err (!%p1647_p0)
}
 0x5d5   : > { %s1721_s12 = smov 128   ;;  %s1722_s10 = smov 8  }
 0x5d6   : > { %1389 = dma.vmem_to_hbm [thread:$0]  (%p2167_p10), %s2086_s27, 512, %s2092_s16, %s2095_s24, %s1721_s12, %s1721_s12, %s1722_s10  }
 0x5d7 PF: > { %p1411_p2 = scmp.ge.s32.totalorder %s1709_s26, 2  ;;  %s1109_s28 = sand.u32 1, %s1689_s21  }
 0x5d8   : > { %p2168_p3 = scmp.ne.s32.totalorder %s2158_s9, 0  ;;  %s1110_s8 = scalar_lea.sflag [#allocation8], %s1109_s28 }
 0x5da   : > { %p1402_p5 = pnand %p1411_p2, %p2168_p3 }
 0x5dc   : > { %1684 = dma.done.wait (!%p1402_p5), %s1110_s8, 512  }
 0x5dd   : > { %1686 = vsyncadd (!%p1402_p5), %s1110_s8, 4294966784  ;;  %s21_s26 = sadd.s32 1, %s1709_s26   ;;  %s2169_s13 = sld [smem:[#allocation18_spill]] }
 0x5de   : > { %p18_p6 = scmp.ge.s32.totalorder %s21_s26, 4   ;;  %s2170_s24 = sld [smem:[#allocation16_spill]] }
 0x5df   : > { %s2171_s25 = sld [smem:[#allocation17_spill]]  ;;  %s2172_s21 = smov %s1693_s22 }
 0x5e0   : > { %s2173_s22 = smov %s1697_s23  ;;  %20 = sbr.rel (!%p18_p6) target bundleno = 6 (0x6), region = 102 }
 0x5e3   : > { %s2174_s23 = smov %s2169_s13 }
 0x5e7   :  { %1115 = vsyncpa [#allocation7], 1 }
 0x5e8   :  { %1117 = vsyncpa [#allocation7 + $0x1], 1 }
 0x5e9   :  { %1118 = vsyncpa [#allocation10], 1 }
 0x5ea   :  { %1119 = vsyncpa [#allocation8], 1 }
 0x5eb   :  { %1121 = vsyncpa [#allocation8 + $0x1], 1 }

</bundles_post_ra>
